<compile_context>
chip_gen: v7x
topology: tpu7x:2x2x1
jax: 0.10.0
libtpu: 0.0.40
codegen_flags: <defaults>
</compile_context>

<pallas_src>
import functools

import jax
import jax.numpy as jnp
from jax.experimental import pallas as pl
from jax.experimental.pallas import tpu as pltpu


def _round_up(x, m):
    return ((x + m - 1) // m) * m


def _choose_tile_m(n, d_pad):
    """Biggest row tile that keeps the per-block VMEM footprint well under budget.

    Budget kept under ~24 MiB so the kernel fits v7x's 32 MiB scoped default
    (64 MiB physical) as well as v5e/v6e.
    """
    n8 = _round_up(n, 8)
    budget = 24 * 1024 * 1024
    h_bytes = n8 * d_pad * 4                      # resident h (RHS of att @ h)
    per_row = n8 * (2 * 1 + 5 * 4)                # 2x int8 adj rows (double buffer)
    #                                             # + ~5 live f32 [tile, n] temporaries
    tile = (budget - h_bytes) // max(per_row, 1)
    tile = min(512, tile)
    if tile >= n8:
        return n8                                 # single block covers all (padded) rows
    return int(max(32, (tile // 32) * 32))        # int8 sublane tiling: multiples of 32


def _project_kernel(x_ref, w_ref, a12_ref, h_ref, wh_ref):
    # h = x @ W                      [TILE_M, D_pad]
    h = jnp.dot(x_ref[...], w_ref[...], preferred_element_type=jnp.float32)
    h_ref[...] = h
    # wh[:, 0] = h @ a1, wh[:, 1] = h @ a2 — single fused [D_pad, 2] RHS.
    wh_ref[...] = jnp.dot(h, a12_ref[...], preferred_element_type=jnp.float32)


def _attention_kernel(wh1_ref, wh2r_ref, adj_ref, h_ref, b_ref, o_ref, *, alpha):
    # Attention logits for this row block: e = leaky_relu(Wh1 + Wh2^T).
    # wh2_row is already [1, N] (transposed in the wrapper) — no in-kernel transpose.
    e = wh1_ref[...] + wh2r_ref[...]                       # [TILE_M, N]
    e = jnp.where(e > 0, e, alpha * e)                     # leaky_relu(negative_slope=alpha)

    # Mask by adjacency (int8 mask -> f32 compare), softmax over dim=1.
    adjf = adj_ref[...].astype(jnp.float32)
    att = jnp.where(adjf > 0.0, e, jnp.float32(-9.0e15))
    att_max = jnp.max(att, axis=1, keepdims=True)
    p = jnp.exp(att - att_max)
    denom = jnp.sum(p, axis=1, keepdims=True)
    att = p * pl.reciprocal(denom, approx=True)            # EUP slot, ~free

    # TODO(synk): F.dropout(attention, training=self.training) — identity in eval mode.

    # h_pass = attention @ h  (operands may be bf16; accumulate in f32).
    h_pass = jnp.dot(att.astype(h_ref.dtype), h_ref[...],
                     preferred_element_type=jnp.float32)

    # ELU (alpha=1). min() keeps the unselected branch finite; exp(x)-1 used since
    # expm1 has no guaranteed Mosaic lowering (difference is ~1e-8 near zero).
    out = jnp.where(h_pass > 0,
                    h_pass,
                    jnp.exp(jnp.minimum(h_pass, 0.0)) - 1.0)

    # F.normalize(p=2, dim=1): row / max(||row||, 1e-12) == row * rsqrt(max(sumsq, 1e-24)).
    sumsq = jnp.sum(out * out, axis=1, keepdims=True)
    out = out * jax.lax.rsqrt(jnp.maximum(sumsq, jnp.float32(1e-24)))

    o_ref[...] = out + b_ref[...]


def attention_layer_forward(x, adj, weight, a, bias, alpha=0.2,
                            matmul_dtype=jnp.float32, tile_m=None):
    """Pallas implementation of AttentionLayer.forward (eval mode).

    x: [N, F_in], adj: [N, N] dense (nonzero == edge), weight: [F_in, D],
    a: [2D, 1], bias: [D]. Returns [N, D] float32.
    """
    n, f_in = x.shape
    d = weight.shape[1]
    d_pad = _round_up(d, 128)                 # lane-dense output / h slab

    if tile_m is None:
        tile_m = _choose_tile_m(n, d_pad)
    n8 = _round_up(n, 8)
    if tile_m >= n8:
        tile_m = n8                           # full-extent block (always legal)
    else:
        tile_m = max(32, (min(int(tile_m), n8) // 32) * 32)
    n_pad = _round_up(n, tile_m)
    grid = (n_pad // tile_m,)

    f32 = jnp.float32
    # Zero-padded operands. Padding is inert: padded D columns of h are zero,
    # padded key columns are masked out, padded query rows are sliced off.
    x_p = jnp.zeros((n_pad, f_in), f32).at[:n, :].set(x.astype(f32))
    w_p = jnp.zeros((f_in, d_pad), f32).at[:, :d].set(weight.astype(f32))
    a12 = jnp.zeros((d_pad, 2), f32)
    a12 = a12.at[:d, 0].set(a[:d, 0].astype(f32)).at[:d, 1].set(a[d:, 0].astype(f32))
    bias_p = jnp.zeros((1, d_pad), f32).at[0, :d].set(bias.reshape(-1).astype(f32))
    # int8 adjacency mask: 4x less DMA traffic / VMEM than float32 adj.
    adj_mask = jnp.zeros((n_pad, n_pad), jnp.int8).at[:n, :n].set(
        (adj > 0).astype(jnp.int8))

    cparams = pltpu.CompilerParams(
        dimension_semantics=("parallel",),     # megacore-shardable row axis
        vmem_limit_bytes=32 * 1024 * 1024,     # explicit; tiles sized well under this
    )

    # Kernel 1: projection (h and the two attention projections), done once.
    h, wh = pl.pallas_call(
        _project_kernel,
        grid=grid,
        in_specs=[
            pl.BlockSpec((tile_m, f_in), lambda i: (i, 0)),
            pl.BlockSpec((f_in, d_pad), lambda i: (0, 0)),
            pl.BlockSpec((d_pad, 2), lambda i: (0, 0)),
        ],
        out_specs=[
            pl.BlockSpec((tile_m, d_pad), lambda i: (i, 0)),
            pl.BlockSpec((tile_m, 2), lambda i: (i, 0)),
        ],
        out_shape=[
            jax.ShapeDtypeStruct((n_pad, d_pad), f32),
            jax.ShapeDtypeStruct((n_pad, 2), f32),
        ],
        compiler_params=cparams,
    )(x_p, w_p, a12)

    wh1 = wh[:, 0:1]                          # [n_pad, 1]
    wh2_row = wh[:, 1:2].reshape(1, n_pad)    # [1, n_pad] — transpose done host-side
    h_mm = h.astype(matmul_dtype)             # bf16 on v6e/v7x for the MXU fast path

    # Kernel 2: masked softmax + att @ h + ELU + L2 normalize + bias, row-tiled.
    out = pl.pallas_call(
        functools.partial(_attention_kernel, alpha=float(alpha)),
        grid=grid,
        in_specs=[
            pl.BlockSpec((tile_m, 1), lambda i: (i, 0)),        # wh1 block
            pl.BlockSpec((1, n_pad), lambda i: (0, 0)),         # wh2 row (full)
            pl.BlockSpec((tile_m, n_pad), lambda i: (i, 0)),    # int8 adj mask block
            pl.BlockSpec((n_pad, d_pad), lambda i: (0, 0)),     # full h (RHS, resident)
            pl.BlockSpec((1, d_pad), lambda i: (0, 0)),         # bias
        ],
        out_specs=pl.BlockSpec((tile_m, d_pad), lambda i: (i, 0)),
        out_shape=jax.ShapeDtypeStruct((n_pad, d_pad), f32),
        compiler_params=cparams,
    )(wh1, wh2_row, adj_mask, h_mm, bias_p)

    return out[:n, :d]


def _xavier_uniform(key, shape, gain):
    fan_in, fan_out = shape[0], shape[1]
    bound = gain * jnp.sqrt(6.0 / (fan_in + fan_out))
    return jax.random.uniform(key, shape, jnp.float32, -bound, bound)


def _reference(x, adj, weight, a, bias, alpha=0.2):
    """Pure-JAX reference mirroring the PyTorch forward (eval mode)."""
    d = weight.shape[1]
    h = x @ weight
    wh1 = h @ a[:d, :]
    wh2 = h @ a[d:, :]
    e = jax.nn.leaky_relu(wh1 + wh2.T, negative_slope=alpha)
    att = jnp.where(adj > 0, e, -9.0e15)
    att = jax.nn.softmax(att, axis=1)
    out = att @ h
    out = jax.nn.elu(out)
    norm = jnp.maximum(jnp.linalg.norm(out, axis=1, keepdims=True), 1e-12)
    out = out / norm
    return out + bias


if __name__ == "__main__":
    key = jax.random.PRNGKey(0)
    k_x, k_adj, k_w, k_wi, k_a, k_b = jax.random.split(key, 6)

    N, F_IN, D = 200, 48, 24          # deliberately not tile-aligned (exercises padding)
    alpha = 0.2
    gain = 1.414

    # Deterministic "reset_parameters"-style init.
    weight = _xavier_uniform(k_w, (F_IN, D), gain)
    weight_interact = _xavier_uniform(k_wi, (F_IN, D), gain)  # unused in forward (parity)
    a = _xavier_uniform(k_a, (2 * D, 1), gain)
    # Module zero-inits bias; use a small nonzero one here to exercise the bias add.
    bias = 0.1 * jax.random.normal(k_b, (D,), jnp.float32)

    # Inputs.
    x = jax.random.normal(k_x, (N, F_IN), jnp.float32)
    adj = (jax.random.uniform(k_adj, (N, N)) > 0.7).astype(jnp.float32)
    adj = jnp.maximum(adj, adj.T)
    adj = jnp.maximum(adj, jnp.eye(N, dtype=jnp.float32))  # self-loops: softmax well-defined

    ref = _reference(x, adj, weight, a, bias, alpha=alpha)

    # f32 matmul path, explicit multi-block row tiling.
    out_f32 = attention_layer_forward(x, adj, weight, a, bias, alpha=alpha,
                                      matmul_dtype=jnp.float32, tile_m=64)
    out_f32 = jax.block_until_ready(out_f32)
    assert out_f32.shape == (N, D)
    # Tolerance accounts for the EUP approx reciprocal / rsqrt (few-e-4 relative).
    assert jnp.allclose(out_f32, ref, atol=1e-3, rtol=1e-3), "f32 path mismatch vs JAX reference"

    # bf16 MXU path (v6e/v7x fast path), auto-chosen tile.
    out_bf16 = attention_layer_forward(x, adj, weight, a, bias, alpha=alpha,
                                       matmul_dtype=jnp.bfloat16)
    out_bf16 = jax.block_until_ready(out_bf16)
    assert out_bf16.shape == (N, D)
    assert jnp.allclose(out_bf16, ref, atol=3e-2, rtol=3e-2), "bf16 path mismatch vs JAX reference"

    print("KERNEL_OK")
</pallas_src>

<mosaic_0001>
module attributes {stable_mosaic.version = 11 : i64} {
  func.func @_project_kernel(%arg0: i32, %arg1: memref<64x48xf32, #tpu.memory_space<vmem>>, %arg2: memref<48x128xf32, #tpu.memory_space<vmem>>, %arg3: memref<128x2xf32, #tpu.memory_space<vmem>>, %arg4: memref<64x128xf32, #tpu.memory_space<vmem>>, %arg5: memref<64x2xf32, #tpu.memory_space<vmem>>) attributes {dimension_semantics = [#tpu.dimension_semantics<parallel>], iteration_bounds = array<i64: 4>, scalar_prefetch = 0 : i64, scratch_operands = 0 : i64, tpu.core_type = #tpu.core_type<tc>, window_params = [{transform_indices = @transform_0, window_bounds = array<i64: 64, 48>}, {pipeline_mode = #tpu.pipeline_mode<synchronous>, transform_indices = @transform_1, window_bounds = array<i64: 48, 128>}, {pipeline_mode = #tpu.pipeline_mode<synchronous>, transform_indices = @transform_2, window_bounds = array<i64: 128, 2>}, {transform_indices = @transform_3, window_bounds = array<i64: 64, 128>}, {transform_indices = @transform_4, window_bounds = array<i64: 64, 2>}]} {
    %c0 = arith.constant 0 : index
    %c0_0 = arith.constant 0 : index
    %0 = vector.load %arg1[%c0, %c0_0] : memref<64x48xf32, #tpu.memory_space<vmem>>, vector<64x48xf32>
    %c0_1 = arith.constant 0 : index
    %c0_2 = arith.constant 0 : index
    %1 = vector.load %arg2[%c0_1, %c0_2] : memref<48x128xf32, #tpu.memory_space<vmem>>, vector<48x128xf32>
    %cst = arith.constant dense<0.000000e+00> : vector<64x128xf32>
    %2 = tpu.matmul %0, %1, %cst {dimension_numbers = #tpu.dot_dimension_numbers<[1], [0], [0], [1], [0, 0, 1, 1], [], []>} : vector<64x48xf32>, vector<48x128xf32>, vector<64x128xf32> -> vector<64x128xf32>
    %c0_3 = arith.constant 0 : index
    %c0_4 = arith.constant 0 : index
    %3 = vector.load %arg4[%c0_3, %c0_4] : memref<64x128xf32, #tpu.memory_space<vmem>>, vector<64x128xf32>
    tpu.vector_store %arg4[%c0_3, %c0_4], %2 {strides = array<i32>} : memref<64x128xf32, #tpu.memory_space<vmem>>, vector<64x128xf32>,
    %c0_5 = arith.constant 0 : index
    %c0_6 = arith.constant 0 : index
    %4 = vector.load %arg3[%c0_5, %c0_6] : memref<128x2xf32, #tpu.memory_space<vmem>>, vector<128x2xf32>
    %cst_7 = arith.constant dense<0.000000e+00> : vector<64x2xf32>
    %5 = tpu.matmul %2, %4, %cst_7 {dimension_numbers = #tpu.dot_dimension_numbers<[1], [0], [0], [1], [0, 0, 1, 1], [], []>} : vector<64x128xf32>, vector<128x2xf32>, vector<64x2xf32> -> vector<64x2xf32>
    %c0_8 = arith.constant 0 : index
    %c0_9 = arith.constant 0 : index
    %6 = vector.load %arg5[%c0_8, %c0_9] : memref<64x2xf32, #tpu.memory_space<vmem>>, vector<64x2xf32>
    tpu.vector_store %arg5[%c0_8, %c0_9], %5 {strides = array<i32>} : memref<64x2xf32, #tpu.memory_space<vmem>>, vector<64x2xf32>,
    return
  }
  func.func @transform_0(%arg0: i32) -> (i32, i32) {
    %c0_i32 = arith.constant 0 : i32
    %c0_i32_0 = arith.constant 0 : i32
    return %arg0, %c0_i32 : i32, i32
  }
  func.func @transform_1(%arg0: i32) -> (i32, i32) {
    %c0_i32 = arith.constant 0 : i32
    %c0_i32_0 = arith.constant 0 : i32
    %c0_i32_1 = arith.constant 0 : i32
    return %c0_i32, %c0_i32_0 : i32, i32
  }
  func.func @transform_2(%arg0: i32) -> (i32, i32) {
    %c0_i32 = arith.constant 0 : i32
    %c0_i32_0 = arith.constant 0 : i32
    %c0_i32_1 = arith.constant 0 : i32
    return %c0_i32, %c0_i32_0 : i32, i32
  }
  func.func @transform_3(%arg0: i32) -> (i32, i32) {
    %c0_i32 = arith.constant 0 : i32
    %c0_i32_0 = arith.constant 0 : i32
    return %arg0, %c0_i32 : i32, i32
  }
  func.func @transform_4(%arg0: i32) -> (i32, i32) {
    %c0_i32 = arith.constant 0 : i32
    %c0_i32_0 = arith.constant 0 : i32
    return %arg0, %c0_i32 : i32, i32
  }
}

</mosaic_0001>

<bundles_post_ra>
// kernel: tpu_custom_call.1
= control target key start
LH: loop header
LB: loop body
LE: loop exit
PB: predicated region body
PF: predicated region fallthrough
CT: control target
= control target key end

     0   :  { %10 = vsyncpa [#allocation3], 0  ;;  %s1119_s0 = inlined_call_operand.vmem [shape: f32[256,48], index: 0, kind: input, shape index: {}]   ;;  %s1120_s1 = inlined_call_operand.vmem [shape: f32[48,128], index: 1, kind: input, shape index: {}]   ;;  %s1121_s2 = inlined_call_operand.vmem [shape: f32[128,2], index: 2, kind: input, shape index: {}]   ;;  %s1122_s3 = inlined_call_operand.hbm [shape: f32[256,128], index: 3, kind: output, shape index: {0}]   ;;  %s1123_s4 = inlined_call_operand.vmem [shape: f32[256,2], index: 4, kind: output, shape index: {1}]  }
   0x1   :  { %12 = vsyncpa [#allocation3 + $0x1], 0  ;;  %s911_s15 = smov 0   ;;  %s913_s16 = smov 0  }
   0x2   :  { %s915_s17 = smov 0   ;;  %s917_s18 = smov 0  }
   0x3 LB: > { %s932_s19 = sadd.s32 4294967295, %s881_s18   ;;  %s605_s20 = sadd.s32 4294967294, %s881_s18   ;;  %s881_s18 = sphi %s917_s18, %s1129_s18   ;;  %s877_s17 = sphi %s915_s17, %s1128_s17   ;;  %s873_s16 = sphi %s913_s16, %s1127_s16   ;;  %s869_s15 = sphi %s911_s15, %s1126_s15  }
   0x4   : > { %s936_s21 = sadd.s32 1, %s881_s18   ;;  %s93_s22 = sadd.s32 1, %s877_s17 }
   0x5   : > { %s90_s23 = ssub.s32 %s881_s18, %s936_s21  ;;  %p103_p0 = scmp.ne.s32.totalorder %s877_s17, %s873_s16 }
   0x6   : > { %p91_p1 = scmp.eq.s32.totalorder %s90_s23, 0  ;;  %p104_p2 = scmp.eq.s32.totalorder %s932_s19, 3 }
   0x7   : > { %p109_p3 = scmp.ne.s32.totalorder %s873_s16, %s869_s15  ;;  %p110_p4 = scmp.eq.s32.totalorder %s605_s20, 3 }
   0x8   : > { %s947_s24 = scalar_select %p91_p1, %s877_s17, %s93_s22  }
   0x9   : > { %p949_p5 = por %p104_p2, %p103_p0  ;;  %p953_p6 = por %p110_p4, %p109_p3 }
   0xa   : > { %p608_p7 = scmp.ge.s32.totalorder %s881_s18, 1  ;;  %p169_p8 = scmp.lt.s32.totalorder %s881_s18, 5 }
   0xc   : > { %p170_p9 = pnand %p608_p7, %p169_p8 }
   0xd   : > { %v221_v0 = vld [vmem:[%s1120_s1] sm:$0xff] (!%p170_p9)  ;;  %v222_v1 = vld [vmem:[%s1120_s1 + $0x8] sm:$0xff] (!%p170_p9)  ;;  %v223_v2 = vld [vmem:[%s1120_s1 + $0x10] sm:$0xff] (!%p170_p9)  ;;  %s610_s7 = sshll.u32 (!%p170_p9), %s932_s19, 3  ;;  %vm227_vm0 = vcmask (!%p170_p9), 392192   ;;  %s190_s29 = sand.u32 (!%p170_p9), 1, %s873_s16  }
   0xe   : > { %173 = sbr.rel (%p170_p9) target bundleno = 468 (0x1d4), region = 32  ;;  %v734_v3 = vpack.c.bf16 (!%p170_p9), %v222_v1, %v221_v0  ;;  %v224_v4 = vld [vmem:[%s1120_s1 + $0x18] sm:$0xff] (!%p170_p9)  ;;  %v225_v5 = vld [vmem:[%s1120_s1 + $0x20] sm:$0xff] (!%p170_p9)  ;;  %v226_v6 = vld [vmem:[%s1120_s1 + $0x28] sm:$0xff] (!%p170_p9)  ;;  %p201_p10 = scmp.lt.s32.totalorder (!%p170_p9), %s610_s7, 31 }
   0xf   : > { %v738_v7 = vpack.c.bf16 (!%p170_p9), %v224_v4, %v223_v2  ;;  %v365_v8 = vld [vmem:[%s1121_s2] sm:$0xff] (!%p170_p9)  ;;  %v366_v9 = vld [vmem:[%s1121_s2 + $0x8] sm:$0xff] (!%p170_p9)  ;;  %v367_v10 = vld [vmem:[%s1121_s2 + $0x10] sm:$0xff] (!%p170_p9)  ;;  %v742_v16 = vpack.c.bf16 (!%p170_p9), %v226_v6, %v225_v5  ;;  %s609_s30 = sshll.u32 (!%p170_p9), %s190_s29, 6  ;;  %s627_s5 = sshll.u32 (!%p170_p9), %s932_s19, 10 }
  0x10   : > { %735 = vmatprep.subr.bf16.mxu0 (!%p170_p9), %v734_v3  ;;  %v746_v11 = vpack.c.bf16 (!%p170_p9), %v366_v9, %v365_v8  ;;  %v368_v12 = vld [vmem:[%s1121_s2 + $0x18] sm:$0xff] (!%p170_p9)  ;;  %v369_v14 = vld [vmem:[%s1121_s2 + $0x20] sm:$0xff] (!%p170_p9)  ;;  %v370_v15 = vld [vmem:[%s1121_s2 + $0x28] sm:$0xff] (!%p170_p9)  ;;  %s1059_s11 = scalar_lea.hbm (!%p170_p9), %s1122_s3, %s627_s5  ;;  %s1065_s12 = scalar_lea.sflag (!%p170_p9), [#allocation3], %s190_s29 }
  0x11   : > { %737 = vmatpush3.bf16.msra.mxu0 (!%p170_p9), %v734_v3  ;;  %v750_v13 = vpack.c.bf16 (!%p170_p9), %v368_v12, %v367_v10  ;;  %v754_v18 = vpack.c.bf16 (!%p170_p9), %v370_v15, %v369_v14  ;;  %v371_v19 = vld [vmem:[%s1121_s2 + $0x30] sm:$0xff] (!%p170_p9)  ;;  %v372_v20 = vld [vmem:[%s1121_s2 + $0x38] sm:$0xff] (!%p170_p9)  ;;  %v373_v23 = vld [vmem:[%s1121_s2 + $0x40] sm:$0xff] (!%p170_p9)  ;;  %s883_s19 = smov (!%p170_p9), [#allocation2]  }
  0x12   : > { %739 = vmatprep.subr.bf16.mxu0 (!%p170_p9), %v738_v7  ;;  %747 = vmatprep.subr.bf16.mxu1 (!%p170_p9), %v746_v11  ;;  %v758_v21 = vpack.c.bf16 (!%p170_p9), %v372_v20, %v371_v19  ;;  %v374_v24 = vld [vmem:[%s1121_s2 + $0x48] sm:$0xff] (!%p170_p9)  ;;  %v375_v28 = vld [vmem:[%s1121_s2 + $0x50] sm:$0xff] (!%p170_p9)  ;;  %v376_v29 = vld [vmem:[%s1121_s2 + $0x58] sm:$0xff] (!%p170_p9)  ;;  %s823_s20 = sshll.u32 (!%p170_p9), %s883_s19, 4  ;;  %s824_s20 = int_to_ptr.vmem [resolvable:$false] %s823_s20 }
  0x13   : > { %749 = vmatpush3.bf16.msra.mxu1 (!%p170_p9), %v746_v11  ;;  %v762_v26 = vpack.c.bf16 (!%p170_p9), %v374_v24, %v373_v23  ;;  %v766_v31 = vpack.c.bf16 (!%p170_p9), %v376_v29, %v375_v28  ;;  %v377_v33 = vld [vmem:[%s1121_s2 + $0x60] sm:$0xff] (!%p170_p9)  ;;  %v378_v34 = vld [vmem:[%s1121_s2 + $0x68] sm:$0xff] (!%p170_p9)  ;;  %v379_v38 = vld [vmem:[%s1121_s2 + $0x70] sm:$0xff] (!%p170_p9)  ;;  %s825_s22 = scalar_lea.vmem (!%p170_p9), %s824_s20, 2048 }
  0x14   : > { %751 = vmatprep.subr.bf16.mxu1 (!%p170_p9), %v750_v13  ;;  %v770_v36 = vpack.c.bf16 (!%p170_p9), %v378_v34, %v377_v33  ;;  %v380_v39 = vld [vmem:[%s1121_s2 + $0x78] sm:$0xff] (!%p170_p9) }
  0x15   : > { %s1131_s7 = smov (!%p201_p10, %s610_s7), 31  ;;  %741 = vmatpush3.bf16.msra.mxu0 %v738_v7  ;;  %v774_v40 = vpack.c.bf16 %v380_v39, %v379_v38 }
  0x16   : > { %s611_s10 = sshll.u32 %s1131_s7, 3  ;;  %743 = vmatprep.subr.bf16.mxu0 %v742_v16 }
  0x17   : > { %s1004_s13 = scalar_lea.vmem %s1119_s0, %s611_s10  ;;  %753 = vmatpush3.bf16.msra.mxu1 %v750_v13 }
  0x18   : > { %v213_v17 = vld [vmem:[%s1004_s13] sm:$0xff]  ;;  %755 = vmatprep.subr.bf16.mxu1 %v754_v18  ;;  %v214_v22 = vld [vmem:[%s1004_s13 + $0x8] sm:$0xff]  ;;  %v215_v25 = vld [vmem:[%s1004_s13 + $0x10] sm:$0xff] }
  0x19   : > { %678 = vmatprep.mubr.msk.f32.mxu0 %vm227_vm0, %v213_v17  ;;  %745 = vmatpush3.bf16.msra.mxu0 %v742_v16  ;;  %v216_v27 = vld [vmem:[%s1004_s13 + $0x18] sm:$0xff]  ;;  %v217_v30 = vld [vmem:[%s1004_s13 + $0x20] sm:$0xff]  ;;  %v218_v32 = vld [vmem:[%s1004_s13 + $0x28] sm:$0xff] }
  0x1a   : > { %v219_v35 = vld [vmem:[%s1004_s13 + $0x30] sm:$0xff]  ;;  %v220_v37 = vld [vmem:[%s1004_s13 + $0x38] sm:$0xff]  ;;  %s192_s13 = scalar_lea.vmem [#allocation2], %s609_s30 }
  0x1b   : > { %757 = vmatpush3.bf16.msra.mxu1 %v754_v18  ;;  %s514_s6 = sshll.u32 %s192_s13, 4  ;;  %s1061_s6 = int_to_ptr.vmem [resolvable:$true] %s514_s6 }
  0x1c   : > { %679 = vmatmul.mubr.msk.f32.vlgmr.msra.gmra.mrb[0].mxu0 %vm227_vm0, %v214_v22  ;;  %759 = vmatprep.subr.bf16.mxu1 %v758_v21  ;;  %s819_s14 = scalar_lea.vmem %s1061_s6, 1024  ;;  %p826_p0 = scmp.lt.s32.totalorder %s1061_s6, %s824_s20 }
  0x1d   : > { %681 = vmatprep.mubr.msk.f32.mxu0 %vm227_vm0, %v215_v25  ;;  %p820_p11 = scmp.ne.s32.totalorder %s1061_s6, %s819_s14  ;;  %p827_p1 = scmp.lt.s32.totalorder %s825_s22, %s819_s14 }
  0x1f   : > { %761 = vmatpush3.bf16.msra.mxu1 %v758_v21  ;;  %p821_p12 = pnand %p820_p11, %p949_p5  ;;  %p828_p2 = por %p827_p1, %p826_p0 }
  0x20   : > { %682 = vmatmul.mubr.msk.f32.gmra.mrb[2].mxu0 %vm227_vm0, %v216_v27  ;;  %763 = vmatprep.subr.bf16.mxu1 %v762_v26 }
  0x21   : > { %684 = vmatprep.mubr.msk.f32.mxu0 %vm227_vm0, %v217_v30  ;;  %p822_p13 = pneg %p821_p12 }
  0x23   : > { %765 = vmatpush3.bf16.msra.mxu1 %v762_v26  ;;  %p829_p3 = pnand %p828_p2, %p822_p13 }
  0x24   : > { %685 = vmatmul.mubr.msk.f32.gmra.mrb[4].mxu0 %vm227_vm0, %v218_v32  ;;  %767 = vmatprep.subr.bf16.mxu1 %v766_v31 }
  0x25   : > { %687 = vmatprep.mubr.msk.f32.mxu0 %vm227_vm0, %v219_v35 }
  0x27   : > { %769 = vmatpush3.bf16.msra.mxu1 %v766_v31 }
  0x28   : > { %688 = vmatmul.mubr.msk.f32.gmra.mrb[6].mxu0 %vm227_vm0, %v220_v37  ;;  %771 = vmatprep.subr.bf16.mxu1 %v770_v36 }
  0x2b   : > { %773 = vmatpush3.bf16.msra.mxu1 %v770_v36 }
  0x2c   : > { %775 = vmatprep.subr.bf16.mxu1 %v774_v40 }
  0x2f   : > { %777 = vmatpush3.bf16.msra.mxu1 %v774_v40 }
  0xef   : > { %v680_v41 = vpop.f32.mrb[0].mxu0 }
  0xf0   : > { %358 = vst [vmem:[%s192_s13 + $0x8] sm:$0xff] %v680_v41  ;;  %v318_v42 = vpop.f32.mrb[1].mxu0 }
  0xf1   : > { %357 = vst [vmem:[%s192_s13] sm:$0xff] %v318_v42  ;;  %722 = vmatprep.mubr.f32.mxu1 %v318_v42 }
  0xf2   : > { %723 = vmatmul.mubr.f32.vlgmr.msra.gmra.mrb[0].mxu1 %v680_v41 }
  0xf3   : > { %v683_v43 = vpop.f32.mrb[2].mxu0 }
  0xf4   : > { %360 = vst [vmem:[%s192_s13 + $0x18] sm:$0xff] %v683_v43  ;;  %v328_v44 = vpop.f32.mrb[3].mxu0 }
  0xf5   : > { %359 = vst [vmem:[%s192_s13 + $0x10] sm:$0xff] %v328_v44  ;;  %725 = vmatprep.mubr.f32.mxu1 %v328_v44 }
  0xf6   : > { %726 = vmatmul.mubr.f32.gmra.mrb[2].mxu1 %v683_v43 }
  0xf7   : > { %v686_v45 = vpop.f32.mrb[4].mxu0 }
  0xf8   : > { %362 = vst [vmem:[%s192_s13 + $0x28] sm:$0xff] %v686_v45  ;;  %v338_v46 = vpop.f32.mrb[5].mxu0 }
  0xf9   : > { %361 = vst [vmem:[%s192_s13 + $0x20] sm:$0xff] %v338_v46  ;;  %728 = vmatprep.mubr.f32.mxu1 %v338_v46 }
  0xfa   : > { %729 = vmatmul.mubr.f32.gmra.mrb[4].mxu1 %v686_v45 }
  0xfb   : > { %v689_v47 = vpop.f32.mrb[6].mxu0 }
  0xfc   : > { %364 = vst [vmem:[%s192_s13 + $0x38] sm:$0xff] %v689_v47  ;;  %v348_v48 = vpop.f32.mrb[7].mxu0 }
  0xfd   : > { %363 = vst [vmem:[%s192_s13 + $0x30] sm:$0xff] %v348_v48  ;;  %731 = vmatprep.mubr.f32.mxu1 %v348_v48 }
  0xfe   : > { %732 = vmatmul.mubr.f32.gmra.mrb[6].mxu1 %v689_v47 }
  0xff   : > { %832 = shalt.err (!%p829_p3)
}
 0x100   : > { %s833_s23 = scalar_lea.hbm %s1059_s11, 1024  ;;  %s837_s29 = scalar_lea.hbm %s1122_s3, 4096 }
 0x101   : > { %p834_p4 = scmp.ne.s32.totalorder %s1059_s11, %s833_s23  ;;  %p838_p9 = scmp.lt.u32.totalorder %s1059_s11, %s1122_s3 }
 0x102   : > { %p839_p10 = scmp.lt.u32.totalorder %s837_s29, %s833_s23  ;;  %p841_p12 = scmp.lt.u32.totalorder %s833_s23, %s1059_s11 }
 0x103   : > { %p835_p7 = pnand %p834_p4, %p949_p5 }
 0x104   : > { %p840_p11 = por %p839_p10, %p838_p9 }
 0x105   : > { %p836_p8 = pneg %p835_p7 }
 0x106   : > { %p842_p13 = por %p841_p12, %p840_p11 }
 0x108   : > { %p843_p0 = pnand %p842_p13, %p836_p8 }
 0x10a   : > { %846 = shalt.err (!%p843_p0)
}
 0x10b   : > { %s884_s5 = smov 128   ;;  %s885_s8 = smov 8   ;;  %vm486_vm1 = vcmask 15360  }
 0x10c   : > { %778 = dma.vmem_to_hbm [thread:$0]  (%p949_p5), %s1061_s6, 1024, %s1059_s11, %s1065_s12, %s884_s5, %s884_s5, %s885_s8  }
 0x10d   : > { %s211_s19 = scalar_lea.vmem %s1123_s4, %s611_s10 }
 0x1c5   : > { %v724_v49 = vpop.f32.mrb[0].mxu1 }
 0x1c6   : > { %488 = vst.msk [vmem:[%s211_s19 + $0x8] sm:$0xff] %vm486_vm1, %v724_v49  ;;  %v447_v50 = vpop.f32.mrb[1].mxu1 }
 0x1c7   : > { %487 = vst.msk [vmem:[%s211_s19] sm:$0xff] %vm486_vm1, %v447_v50 }
 0x1c9   : > { %v727_v51 = vpop.f32.mrb[2].mxu1 }
 0x1ca   : > { %490 = vst.msk [vmem:[%s211_s19 + $0x18] sm:$0xff] %vm486_vm1, %v727_v51  ;;  %v457_v52 = vpop.f32.mrb[3].mxu1 }
 0x1cb   : > { %489 = vst.msk [vmem:[%s211_s19 + $0x10] sm:$0xff] %vm486_vm1, %v457_v52 }
 0x1cd   : > { %v730_v53 = vpop.f32.mrb[4].mxu1 }
 0x1ce   : > { %492 = vst.msk [vmem:[%s211_s19 + $0x28] sm:$0xff] %vm486_vm1, %v730_v53  ;;  %v467_v54 = vpop.f32.mrb[5].mxu1 }
 0x1cf   : > { %491 = vst.msk [vmem:[%s211_s19 + $0x20] sm:$0xff] %vm486_vm1, %v467_v54 }
 0x1d1   : > { %v733_v55 = vpop.f32.mrb[6].mxu1 }
 0x1d2   : > { %494 = vst.msk [vmem:[%s211_s19 + $0x38] sm:$0xff] %vm486_vm1, %v733_v55  ;;  %v477_v56 = vpop.f32.mrb[7].mxu1 }
 0x1d3   : > { %493 = vst.msk [vmem:[%s211_s19 + $0x30] sm:$0xff] %vm486_vm1, %v477_v56 }
 0x1d4 PF: > { %p784_p5 = scmp.ge.s32.totalorder %s881_s18, 2  ;;  %s533_s25 = sand.u32 1, %s869_s15  }
 0x1d5   : > { %s534_s7 = scalar_lea.sflag [#allocation3], %s533_s25 }
 0x1d6   : > { %p781_p1 = pnand %p784_p5, %p953_p6 }
 0x1d8   : > { %864 = dma.done.wait (!%p781_p1), %s534_s7, 1024  }
 0x1d9   : > { %866 = vsyncadd (!%p781_p1), %s534_s7, 4294966272  ;;  %p15_p2 = scmp.ge.s32.totalorder %s936_s21, 6   ;;  %s1126_s15 = smov %s873_s16 }
 0x1da   : > { %s1127_s16 = smov %s877_s17  ;;  %s1128_s17 = smov %s947_s24 }
 0x1db   : > { %s1129_s18 = smov %s936_s21  ;;  %17 = sbr.rel (!%p15_p2) target bundleno = 3 (0x3), region = 79 }
 0x1e2   :  { %547 = vsyncpa [#allocation3], 1 }
 0x1e3   :  { %549 = vsyncpa [#allocation3 + $0x1], 1 }

</bundles_post_ra>
